<compile_context>
chip_gen: v7x
topology: tpu7x:2x2x1
jax: 0.10.0
libtpu: 0.0.40
codegen_flags: <defaults>
</compile_context>

<pallas_src>
import jax
import jax.numpy as jnp
from jax.experimental import pallas as pl
from jax.experimental.pallas import tpu as pltpu


def _round_up(n: int, m: int) -> int:
    return ((n + m - 1) // m) * m


def portfolio_mlp_kernel(x_ref, w1_ref, b1_ref, w2_ref, b2_ref, w3_ref, b3_ref, o_ref):
    # fc1 + relu: bf16 x bf16 -> f32 accumulation on the MXU, bias add + relu in f32 (VPU).
    x = x_ref[...].astype(w1_ref.dtype)
    h1 = jnp.dot(x, w1_ref[...], preferred_element_type=jnp.float32) + b1_ref[...]
    h1 = jnp.maximum(h1, 0.0)
    # fc2 + relu
    h2 = jnp.dot(h1.astype(w2_ref.dtype), w2_ref[...],
                 preferred_element_type=jnp.float32) + b2_ref[...]
    h2 = jnp.maximum(h2, 0.0)
    # fc3 (no activation)
    o_ref[...] = (jnp.dot(h2.astype(w3_ref.dtype), w3_ref[...],
                          preferred_element_type=jnp.float32)
                  + b3_ref[...]).astype(o_ref.dtype)


def portfolio_net(x, w1, b1, w2, b2, w3, b3, *, tile_b: int = 2048):
    """x: (B, in) f32; wN: (in, out) bf16 (see prepare_params); bN: (1, out) f32.

    Returns (B, out) f32. Feature dims are NOT padded in HBM; lane padding happens only
    inside VMEM.
    """
    B, in_size = x.shape
    hid = w1.shape[1]
    out_size = w3.shape[1]

    # Batch tile: multiple of 8 (sublane), capped at tile_b, and capped again so the grid
    # has >= 2 steps whenever possible (keeps both v7x TensorCores busy).
    b8 = _round_up(B, 8)
    tb = min(_round_up(tile_b, 8), b8)
    if b8 >= 16 and pl.cdiv(B, tb) < 2:
        tb = _round_up(pl.cdiv(b8, 2), 8)
    grid = (pl.cdiv(B, tb),)

    flops = 2 * B * (in_size * hid + hid * hid + hid * out_size)
    bytes_accessed = (x.size * x.dtype.itemsize
                      + (w1.size + w2.size + w3.size) * 2
                      + (b1.size + b2.size + b3.size) * 4
                      + B * out_size * 4)

    return pl.pallas_call(
        portfolio_mlp_kernel,
        out_shape=jax.ShapeDtypeStruct((B, out_size), jnp.float32),
        grid_spec=pltpu.PrefetchScalarGridSpec(
            num_scalar_prefetch=0,
            grid=grid,
            in_specs=[
                # x: batch-tiled, double-buffered; last dim == full array dim (legal per
                # the (8,128) rule), so no padded HBM reads.
                pl.BlockSpec((tb, in_size), lambda i: (i, 0)),
                # weights / biases: same block every step -> DMA'd once, stay resident.
                pl.BlockSpec((in_size, hid), lambda i: (0, 0)),
                pl.BlockSpec((1, hid), lambda i: (0, 0)),
                pl.BlockSpec((hid, hid), lambda i: (0, 0)),
                pl.BlockSpec((1, hid), lambda i: (0, 0)),
                pl.BlockSpec((hid, out_size), lambda i: (0, 0)),
                pl.BlockSpec((1, out_size), lambda i: (0, 0)),
            ],
            out_specs=pl.BlockSpec((tb, out_size), lambda i: (i, 0)),
        ),
        compiler_params=pltpu.CompilerParams(
            dimension_semantics=("parallel",),  # shard batch tiles across v7x's 2 TCs
        ),
        cost_estimate=pl.CostEstimate(
            flops=flops, transcendentals=0, bytes_accessed=bytes_accessed),
    )(x, w1, b1, w2, b2, w3, b3)


# Jitted entry point (tile_b is a Python/static knob).
portfolio_net_jit = jax.jit(portfolio_net, static_argnames=("tile_b",))


def prepare_params(w1, b1, w2, b2, w3, b3):
    """One-time prep hoisted out of the per-call path: bf16 weights, f32 biases."""
    bf16, f32 = jnp.bfloat16, jnp.float32
    return (w1.astype(bf16), b1.astype(f32),
            w2.astype(bf16), b2.astype(f32),
            w3.astype(bf16), b3.astype(f32))


def init_linear_params(key, in_features, out_features):
    """Deterministic init mimicking nn.Linear's uniform(-1/sqrt(in), 1/sqrt(in))."""
    kw, kb = jax.random.split(key)
    bound = 1.0 / jnp.sqrt(jnp.float32(in_features))
    # Stored as (in, out) so the kernel does x @ W (PyTorch stores (out, in), uses x @ W.T).
    w = jax.random.uniform(kw, (in_features, out_features), jnp.float32, -bound, bound)
    b = jax.random.uniform(kb, (1, out_features), jnp.float32, -bound, bound)
    return w, b


def reference_forward_bf16(x, w1, b1, w2, b2, w3, b3):
    """Mirrors the kernel's bf16-input / f32-accumulate numerics."""
    q = lambda a: a.astype(jnp.bfloat16).astype(jnp.float32)
    h1 = jnp.maximum(q(x) @ q(w1) + b1, 0.0)
    h2 = jnp.maximum(q(h1) @ q(w2) + b2, 0.0)
    return q(h2) @ q(w3) + b3


def reference_forward_f32(x, w1, b1, w2, b2, w3, b3):
    h1 = jnp.maximum(x @ w1 + b1, 0.0)
    h2 = jnp.maximum(h1 @ w2 + b2, 0.0)
    return h2 @ w3 + b3


if __name__ == "__main__":
    # Small shapes consistent with PortfolioNet(input_size, hidden_size, output_size).
    batch = 8
    input_size = 16
    hidden_size = 32
    output_size = 4

    key = jax.random.PRNGKey(0)
    kx, k1, k2, k3 = jax.random.split(key, 4)

    x = jax.random.normal(kx, (batch, input_size), jnp.float32)
    w1, b1 = init_linear_params(k1, input_size, hidden_size)
    w2, b2 = init_linear_params(k2, hidden_size, hidden_size)
    w3, b3 = init_linear_params(k3, hidden_size, output_size)

    params = prepare_params(w1, b1, w2, b2, w3, b3)

    out = jax.block_until_ready(portfolio_net_jit(x, *params))
    assert out.shape == (batch, output_size)

    # Tight check against a reference mirroring the kernel's bf16/f32 numerics.
    ref_bf16 = reference_forward_bf16(x, w1, b1, w2, b2, w3, b3)
    assert jnp.allclose(out, ref_bf16, atol=2e-4, rtol=2e-4), \
        "Pallas output mismatch vs bf16-mirrored reference"

    # Looser sanity check against the pure-f32 PyTorch-equivalent forward.
    ref_f32 = reference_forward_f32(x, w1, b1, w2, b2, w3, b3)
    assert jnp.allclose(out, ref_f32, atol=5e-2, rtol=5e-2), \
        "Pallas output diverges from f32 reference beyond bf16 tolerance"

    # Exercise a multi-step grid and a ragged last tile (edge-block masking): B=200, tb=64
    # -> grid of 4 steps, last block only 8 valid rows.
    x2 = jax.random.normal(jax.random.fold_in(kx, 1), (200, input_size), jnp.float32)
    out2 = jax.block_until_ready(portfolio_net_jit(x2, *params, tile_b=64))
    ref2 = reference_forward_bf16(x2, w1, b1, w2, b2, w3, b3)
    assert out2.shape == (200, output_size)
    assert jnp.allclose(out2, ref2, atol=2e-4, rtol=2e-4), \
        "Pallas output mismatch on multi-tile / ragged-batch case"

    print("KERNEL_OK")
</pallas_src>

<mosaic_0001>
module attributes {stable_mosaic.version = 11 : i64} {
  func.func @portfolio_mlp_kernel(%arg0: i32, %arg1: memref<8x16xf32, #tpu.memory_space<vmem>>, %arg2: memref<16x32xbf16, #tpu.memory_space<vmem>>, %arg3: memref<1x32xf32, #tpu.memory_space<vmem>>, %arg4: memref<32x32xbf16, #tpu.memory_space<vmem>>, %arg5: memref<1x32xf32, #tpu.memory_space<vmem>>, %arg6: memref<32x4xbf16, #tpu.memory_space<vmem>>, %arg7: memref<1x4xf32, #tpu.memory_space<vmem>>, %arg8: memref<8x4xf32, #tpu.memory_space<vmem>>) attributes {dimension_semantics = [#tpu.dimension_semantics<parallel>], iteration_bounds = array<i64: 1>, scalar_prefetch = 0 : i64, scratch_operands = 0 : i64, tpu.core_type = #tpu.core_type<tc>, window_params = [{transform_indices = @transform_0, window_bounds = array<i64: 8, 16>}, {pipeline_mode = #tpu.pipeline_mode<synchronous>, transform_indices = @transform_1, window_bounds = array<i64: 16, 32>}, {pipeline_mode = #tpu.pipeline_mode<synchronous>, transform_indices = @transform_2, window_bounds = array<i64: 1, 32>}, {pipeline_mode = #tpu.pipeline_mode<synchronous>, transform_indices = @transform_3, window_bounds = array<i64: 32, 32>}, {pipeline_mode = #tpu.pipeline_mode<synchronous>, transform_indices = @transform_4, window_bounds = array<i64: 1, 32>}, {pipeline_mode = #tpu.pipeline_mode<synchronous>, transform_indices = @transform_5, window_bounds = array<i64: 32, 4>}, {pipeline_mode = #tpu.pipeline_mode<synchronous>, transform_indices = @transform_6, window_bounds = array<i64: 1, 4>}, {transform_indices = @transform_7, window_bounds = array<i64: 8, 4>}]} {
    %c0 = arith.constant 0 : index
    %c0_0 = arith.constant 0 : index
    %0 = vector.load %arg1[%c0, %c0_0] : memref<8x16xf32, #tpu.memory_space<vmem>>, vector<8x16xf32>
    %1 = arith.truncf %0 : vector<8x16xf32> to vector<8x16xbf16>
    %c0_1 = arith.constant 0 : index
    %c0_2 = arith.constant 0 : index
    %2 = vector.load %arg2[%c0_1, %c0_2] : memref<16x32xbf16, #tpu.memory_space<vmem>>, vector<16x32xbf16>
    %cst = arith.constant dense<0.000000e+00> : vector<8x32xf32>
    %3 = tpu.matmul %1, %2, %cst {dimension_numbers = #tpu.dot_dimension_numbers<[1], [0], [0], [1], [0, 0, 1, 1], [], []>} : vector<8x16xbf16>, vector<16x32xbf16>, vector<8x32xf32> -> vector<8x32xf32>
    %c0_3 = arith.constant 0 : index
    %c0_4 = arith.constant 0 : index
    %4 = vector.load %arg3[%c0_3, %c0_4] : memref<1x32xf32, #tpu.memory_space<vmem>>, vector<1x32xf32>
    %5 = vector.broadcast %4 : vector<1x32xf32> to vector<8x32xf32>
    %6 = arith.addf %3, %5 : vector<8x32xf32>
    %cst_5 = arith.constant 0.000000e+00 : f32
    %7 = vector.broadcast %cst_5 : f32 to vector<8x32xf32>
    %8 = arith.maximumf %6, %7 : vector<8x32xf32>
    %9 = arith.truncf %8 : vector<8x32xf32> to vector<8x32xbf16>
    %c0_6 = arith.constant 0 : index
    %c0_7 = arith.constant 0 : index
    %10 = vector.load %arg4[%c0_6, %c0_7] : memref<32x32xbf16, #tpu.memory_space<vmem>>, vector<32x32xbf16>
    %cst_8 = arith.constant dense<0.000000e+00> : vector<8x32xf32>
    %11 = tpu.matmul %9, %10, %cst_8 {dimension_numbers = #tpu.dot_dimension_numbers<[1], [0], [0], [1], [0, 0, 1, 1], [], []>} : vector<8x32xbf16>, vector<32x32xbf16>, vector<8x32xf32> -> vector<8x32xf32>
    %c0_9 = arith.constant 0 : index
    %c0_10 = arith.constant 0 : index
    %12 = vector.load %arg5[%c0_9, %c0_10] : memref<1x32xf32, #tpu.memory_space<vmem>>, vector<1x32xf32>
    %13 = vector.broadcast %12 : vector<1x32xf32> to vector<8x32xf32>
    %14 = arith.addf %11, %13 : vector<8x32xf32>
    %cst_11 = arith.constant 0.000000e+00 : f32
    %15 = vector.broadcast %cst_11 : f32 to vector<8x32xf32>
    %16 = arith.maximumf %14, %15 : vector<8x32xf32>
    %17 = arith.truncf %16 : vector<8x32xf32> to vector<8x32xbf16>
    %c0_12 = arith.constant 0 : index
    %c0_13 = arith.constant 0 : index
    %18 = vector.load %arg6[%c0_12, %c0_13] : memref<32x4xbf16, #tpu.memory_space<vmem>>, vector<32x4xbf16>
    %cst_14 = arith.constant dense<0.000000e+00> : vector<8x4xf32>
    %19 = tpu.matmul %17, %18, %cst_14 {dimension_numbers = #tpu.dot_dimension_numbers<[1], [0], [0], [1], [0, 0, 1, 1], [], []>} : vector<8x32xbf16>, vector<32x4xbf16>, vector<8x4xf32> -> vector<8x4xf32>
    %c0_15 = arith.constant 0 : index
    %c0_16 = arith.constant 0 : index
    %20 = vector.load %arg7[%c0_15, %c0_16] : memref<1x4xf32, #tpu.memory_space<vmem>>, vector<1x4xf32>
    %21 = vector.broadcast %20 : vector<1x4xf32> to vector<8x4xf32>
    %22 = arith.addf %19, %21 : vector<8x4xf32>
    %c0_17 = arith.constant 0 : index
    %c0_18 = arith.constant 0 : index
    %23 = vector.load %arg8[%c0_17, %c0_18] : memref<8x4xf32, #tpu.memory_space<vmem>>, vector<8x4xf32>
    tpu.vector_store %arg8[%c0_17, %c0_18], %22 {strides = array<i32>} : memref<8x4xf32, #tpu.memory_space<vmem>>, vector<8x4xf32>,
    return
  }
  func.func @transform_0(%arg0: i32) -> (i32, i32) {
    %c0_i32 = arith.constant 0 : i32
    %c0_i32_0 = arith.constant 0 : i32
    return %arg0, %c0_i32 : i32, i32
  }
  func.func @transform_1(%arg0: i32) -> (i32, i32) {
    %c0_i32 = arith.constant 0 : i32
    %c0_i32_0 = arith.constant 0 : i32
    %c0_i32_1 = arith.constant 0 : i32
    return %c0_i32, %c0_i32_0 : i32, i32
  }
  func.func @transform_2(%arg0: i32) -> (i32, i32) {
    %c0_i32 = arith.constant 0 : i32
    %c0_i32_0 = arith.constant 0 : i32
    %c0_i32_1 = arith.constant 0 : i32
    return %c0_i32, %c0_i32_0 : i32, i32
  }
  func.func @transform_3(%arg0: i32) -> (i32, i32) {
    %c0_i32 = arith.constant 0 : i32
    %c0_i32_0 = arith.constant 0 : i32
    %c0_i32_1 = arith.constant 0 : i32
    return %c0_i32, %c0_i32_0 : i32, i32
  }
  func.func @transform_4(%arg0: i32) -> (i32, i32) {
    %c0_i32 = arith.constant 0 : i32
    %c0_i32_0 = arith.constant 0 : i32
    %c0_i32_1 = arith.constant 0 : i32
    return %c0_i32, %c0_i32_0 : i32, i32
  }
  func.func @transform_5(%arg0: i32) -> (i32, i32) {
    %c0_i32 = arith.constant 0 : i32
    %c0_i32_0 = arith.constant 0 : i32
    %c0_i32_1 = arith.constant 0 : i32
    return %c0_i32, %c0_i32_0 : i32, i32
  }
  func.func @transform_6(%arg0: i32) -> (i32, i32) {
    %c0_i32 = arith.constant 0 : i32
    %c0_i32_0 = arith.constant 0 : i32
    %c0_i32_1 = arith.constant 0 : i32
    return %c0_i32, %c0_i32_0 : i32, i32
  }
  func.func @transform_7(%arg0: i32) -> (i32, i32) {
    %c0_i32 = arith.constant 0 : i32
    %c0_i32_0 = arith.constant 0 : i32
    return %arg0, %c0_i32 : i32, i32
  }
}

</mosaic_0001>

<bundles_post_ra>
// kernel: portfolio_net.1
= control target key start
LH: loop header
LB: loop body
LE: loop exit
PB: predicated region body
PF: predicated region fallthrough
CT: control target
= control target key end

     0   :  { %12 = vsyncpa [#allocation3], 0  ;;  %s321_s24 = smov [#allocation2]   ;;  %s405_s0 = inlined_call_operand.vmem [shape: f32[8,16], index: 0, kind: input, shape index: {}]   ;;  %s406_s1 = inlined_call_operand.hbm [shape: bf16[16,32], index: 1, kind: input, shape index: {}]   ;;  %s407_s2 = inlined_call_operand.vmem [shape: f32[1,32], index: 2, kind: input, shape index: {}]   ;;  %s408_s3 = inlined_call_operand.vmem [shape: bf16[32,32], index: 3, kind: input, shape index: {}]   ;;  %s409_s4 = inlined_call_operand.vmem [shape: f32[1,32], index: 4, kind: input, shape index: {}]   ;;  %s410_s5 = inlined_call_operand.vmem [shape: bf16[32,4], index: 5, kind: input, shape index: {}]   ;;  %s411_s6 = inlined_call_operand.vmem [shape: f32[1,4], index: 6, kind: input, shape index: {}]   ;;  %s412_s7 = inlined_call_operand.vmem [shape: f32[8,4], index: 7, kind: output, shape index: {}]  }
   0x1   :  { %s20_s25 = sshll.u32 %s321_s24, 4  ;;  %s297_s28 = scalar_lea.hbm %s406_s1, 128  ;;  %s21_s25 = int_to_ptr.vmem [resolvable:$true] %s20_s25 }
   0x2   :  { %p298_p0 = scmp.ne.s32.totalorder %s406_s1, %s297_s28  ;;  %p301_p1 = scmp.lt.u32.totalorder %s297_s28, %s406_s1 }
   0x4   :  { %p303_p2 = pnand %p301_p1, %p298_p0 }
   0x6   :  { %306 = shalt.err (!%p303_p2)
}
   0x7   :  { %s307_s10 = scalar_lea.vmem %s21_s25, 128  ;;  %p312_p4 = scmp.lt.s32.totalorder %s21_s25, %s21_s25 }
   0x8   :  { %p308_p3 = scmp.ne.s32.totalorder %s21_s25, %s307_s10  ;;  %p313_p5 = scmp.lt.s32.totalorder %s307_s10, %s307_s10 }
   0xa   :  { %p314_p6 = por %p313_p5, %p312_p4 }
   0xc   :  { %p315_p7 = pnand %p314_p6, %p308_p3 }
   0xe   :  { %318 = shalt.err (!%p315_p7)
}
   0xf   :  { %s322_s11 = smov 64   ;;  %s323_s12 = smov 4  }
  0x10   :  { %26 = dma.hbm_to_vmem [thread:$0]  %s406_s1, 128, %s21_s25, [#allocation3], %s322_s11, %s322_s11, %s323_s12  }
  0x11   :  { %319 = dma.done.wait [#allocation3], 128  }
  0x12   :  { %320 = vsyncadd [#allocation3], 4294967168  ;;  %v324_v0 = vmov 0.0   ;;  %vm325_vm0 = vmmov 0   ;;  %v292_v1 = vld [vmem:[#allocation2] sm:$0xff]   ;;  %vm58_vm1 = vcmask 130048  }
  0x13   :  { %265 = vmatprep.subr.bf16.mxu0 %v324_v0  ;;  %267 = vmatprep.mubr.msk.bf16.mxu0 %vm325_vm0, %v324_v0  ;;  %v41_v2 = vld [vmem:[%s405_s0] sm:$0xff]  ;;  %v294_v5 = vld [vmem:[%s408_s3 + $0x8] sm:$0xff]   ;;  %vm127_vm2 = vcmask 261120   ;;  %vm239_vm3 = vcmask 31744  }
  0x14   :  { %271 = vmatprep.subr.bf16.mxu1 %v324_v0  ;;  %275 = vmatprep.mubr.msk.bf16.mxu1 %vm325_vm0, %v324_v0  ;;  %v42_v3 = vpack.c.bf16 %v41_v2, %v41_v2  ;;  %v293_v4 = vld [vmem:[%s408_s3] sm:$0xff]   ;;  %v296_v15 = vld [vmem:[%s410_s5 + $0x8] sm:$0xff]  }
  0x15   :  { %266 = vmatpush3.bf16.msra.mxu0 %v292_v1  ;;  %272 = vmatpush3.bf16.msra.mxu1 %v293_v4  ;;  %v295_v6 = vld [vmem:[%s410_s5] sm:$0xff]  }
  0x16   :  { %279 = vmatprep.subr.bf16.mxu0 %v324_v0  ;;  %273 = vmatprep.subr.bf16.mxu1 %v324_v0  ;;  %v246_v7 = vld [vmem:[%s407_s2] ss:$0 sm:$0xff] }
  0x17   :  { %v249_v16 = vld [vmem:[%s409_s4] ss:$0 sm:$0xff] }
  0x18   :  { %268 = vmatmul.mubr.msk.bf16.vlgmr.msra.gmra.mrb[0].mxu0 %vm58_vm1, %v42_v3  ;;  %v253_v24 = vld [vmem:[%s411_s6] ss:$0 sm:$0xff] }
  0x19   :  { %283 = vmatprep.mubr.msk.bf16.mxu0 %vm325_vm0, %v324_v0  ;;  %274 = vmatpush3.bf16.msra.mxu1 %v294_v5 }
  0x1a   :  { %280 = vmatpush3.bf16.msra.mxu0 %v295_v6 }
  0x1b   :  { %281 = vmatprep.subr.bf16.mxu0 %v324_v0 }
  0x1e   :  { %282 = vmatpush3.bf16.msra.mxu0 %v296_v15 }
  0xeb   :  { %v96_v8 = vpop.f32.mrb[0].mxu0 }
  0xec   :  { %v97_v9 = vadd.f32 %v246_v7, %v96_v8  ;;  %v269_v10 = vpop.f32.mrb[1].mxu0 }
  0xed   :  { %v99_v11 = vpop.f32.mrb[2].mxu0 }
  0xee   :  { %v102_v12 = vmax.f32 %v97_v9, 0.0  ;;  %v270_v13 = vpop.f32.mrb[3].mxu0 }
  0xf0   :  { %v103_v14 = vpack.c.bf16 %v102_v12, %v102_v12 }
  0xf2   :  { %276 = vmatmul.mubr.msk.bf16.vlgmr.msra.gmra.mrb[0].mxu1 %vm127_vm2, %v103_v14 }
 0x1c5   :  { %v165_v17 = vpop.f32.mrb[0].mxu1 }
 0x1c6   :  { %v166_v18 = vadd.f32 %v249_v16, %v165_v17  ;;  %v277_v19 = vpop.f32.mrb[1].mxu1 }
 0x1c7   :  { %v168_v20 = vpop.f32.mrb[2].mxu1 }
 0x1c8   :  { %v171_v21 = vmax.f32 %v166_v18, 0.0  ;;  %v278_v22 = vpop.f32.mrb[3].mxu1 }
 0x1ca   :  { %v172_v23 = vpack.c.bf16 %v171_v21, %v171_v21 }
 0x1cc   :  { %284 = vmatmul.mubr.msk.bf16.vlgmr.msra.gmra.mrb[4].mxu0 %vm127_vm2, %v172_v23 }
 0x29f   :  { %v233_v25 = vpop.f32.mrb[4].mxu0 }
 0x2a0   :  { %v234_v26 = vadd.f32 %v253_v24, %v233_v25  ;;  %v285_v27 = vpop.f32.mrb[5].mxu0 }
 0x2a1   :  { %v236_v28 = vpop.f32.mrb[6].mxu0 }
 0x2a2   :  { %240 = vst.msk [vmem:[%s412_s7] sm:$0xff] %vm239_vm3, %v234_v26  ;;  %v286_v29 = vpop.f32.mrb[7].mxu0 }
 0x2a3   :  { %245 = vsyncpa [#allocation3], 1 }

</bundles_post_ra>
